<compile_context>
chip_gen: v7x
topology: tpu7x:2x2x1
jax: 0.10.0
libtpu: 0.0.40
codegen_flags: <defaults>
</compile_context>

<pallas_src>
import jax
import jax.numpy as jnp
from jax.experimental import pallas as pl
from jax.experimental.pallas import tpu as pltpu

INPUT_DIMS = 3
FC1_DIMS = 20
FC2_DIMS = 26
FC3_DIMS = 2
OUT_DIMS = 1

LANE = 128      # padded hidden-feature width (sublane dim of activations)
FEAT_PAD = 8    # padded input-feature rows (sublane multiple of 8)
OUT_PAD = 8     # padded output rows (sublane multiple of 8)
TB = 256        # batch tile on the lane axis -- sweep 128/256/512 for large B


def _mlp_kernel(x_ref, w_ref, b_ref, o_ref):
    # Activations are [feature, batch] = [sublanes, lanes].
    # w_ref[l] is the PyTorch-native [out, in] weight zero-padded to 128x128,
    # b_ref[l] is the bias as a [128, 1] column, so each layer is W @ h + b.
    x = x_ref[...]                      # (FEAT_PAD, TB); rows >= INPUT_DIMS are zero
    w1 = w_ref[0]                       # (128, 128)

    # fc1: only 3 input features -> 3 VPU broadcast outer-product FMAs
    # (a K=3 MXU dot would waste the whole systolic pass).
    z = b_ref[0]                        # (128, 1)
    z = z + w1[:, 0:1] * x[0:1, :]      # (128,1)*(1,TB) -> (128,TB)
    z = z + w1[:, 1:2] * x[1:2, :]
    z = z + w1[:, 2:3] * x[2:3, :]
    h = jnp.tanh(z)                     # (128, TB); padded rows stay tanh(0)=0

    # fc2: full 128x128 padded MXU matmul (zero padding keeps the math exact).
    h = jnp.tanh(jnp.dot(w_ref[1], h, preferred_element_type=jnp.float32)
                 + b_ref[1])            # (128, TB)

    # fc3: only 2 real outputs -> slice the LHS to its first 8 rows so the MXU
    # produces an (8, TB) result and the bias/tanh work is 16x smaller.
    z3 = jnp.dot(w_ref[2, 0:OUT_PAD, :], h,
                 preferred_element_type=jnp.float32) + b_ref[2, 0:OUT_PAD, :]
    h3 = jnp.tanh(z3)                   # (8, TB); rows >= FC3_DIMS are exactly 0

    # fc4 (no activation): 1 output from 2 features -> 2 VPU broadcast FMAs.
    # Zero-padded weight/bias rows keep rows 1..7 of the slab at 0.
    w4c0 = w_ref[3, 0:OUT_PAD, 0:1]     # (8, 1): [w4_00, 0, ..., 0]
    w4c1 = w_ref[3, 0:OUT_PAD, 1:2]     # (8, 1): [w4_01, 0, ..., 0]
    z4 = b_ref[3, 0:OUT_PAD, :] + w4c0 * h3[0:1, :] + w4c1 * h3[1:2, :]
    o_ref[...] = z4                     # lane-dense (8, TB) writeback


def prepare_params(params):
    """Pad + stack weights/biases ONCE (call outside the per-step forward)."""
    w_stack = jnp.zeros((4, LANE, LANE), jnp.float32)
    b_stack = jnp.zeros((4, LANE, 1), jnp.float32)
    for l, (w, b) in enumerate(params):                  # w: [out, in] (PyTorch layout)
        w_stack = w_stack.at[l, : w.shape[0], : w.shape[1]].set(w.astype(jnp.float32))
        b_stack = b_stack.at[l, : b.shape[0], 0].set(b.astype(jnp.float32))
    return w_stack, b_stack


@jax.jit
def value_network_forward(x, w_stack, b_stack):
    """x: [B, INPUT_DIMS] float32 -> [B, OUT_DIMS] float32."""
    B = x.shape[0]
    B_pad = pl.cdiv(B, TB) * TB

    # Feature-major input slab: [FEAT_PAD, B_pad] (8 rows of padding, not 128 lanes).
    x_t = jnp.pad(x.astype(jnp.float32).T,
                  ((0, FEAT_PAD - INPUT_DIMS), (0, B_pad - B)))

    out = pl.pallas_call(
        _mlp_kernel,
        out_shape=jax.ShapeDtypeStruct((OUT_PAD, B_pad), jnp.float32),
        grid_spec=pltpu.PrefetchScalarGridSpec(
            num_scalar_prefetch=0,
            grid=(B_pad // TB,),
            in_specs=[
                pl.BlockSpec((FEAT_PAD, TB), lambda i: (0, i)),       # x tile
                pl.BlockSpec((4, LANE, LANE), lambda i: (0, 0, 0)),   # stacked weights
                pl.BlockSpec((4, LANE, 1), lambda i: (0, 0, 0)),      # stacked biases
            ],
            out_specs=pl.BlockSpec((OUT_PAD, TB), lambda i: (0, i)),
        ),
        compiler_params=pltpu.CompilerParams(
            dimension_semantics=("parallel",)),
    )(x_t, w_stack, b_stack)

    return out[:OUT_DIMS, :B].T          # [B, OUT_DIMS]


def _xavier_uniform(key, fan_out, fan_in):
    # matches nn.init.xavier_uniform_ on a PyTorch [out, in] weight
    bound = jnp.sqrt(6.0 / (fan_in + fan_out))
    return jax.random.uniform(key, (fan_out, fan_in), jnp.float32,
                              minval=-bound, maxval=bound)


def init_params(key):
    k1, k2, k3, k4 = jax.random.split(key, 4)
    bias = lambda n: jnp.full((n,), 0.001, jnp.float32)
    return (
        (_xavier_uniform(k1, FC1_DIMS, INPUT_DIMS), bias(FC1_DIMS)),
        (_xavier_uniform(k2, FC2_DIMS, FC1_DIMS), bias(FC2_DIMS)),
        (_xavier_uniform(k3, FC3_DIMS, FC2_DIMS), bias(FC3_DIMS)),
        (_xavier_uniform(k4, OUT_DIMS, FC3_DIMS), bias(OUT_DIMS)),
    )


def _reference_forward(x, params):
    (w1, b1), (w2, b2), (w3, b3), (w4, b4) = params
    h = jnp.tanh(x @ w1.T + b1)
    h = jnp.tanh(h @ w2.T + b2)
    h = jnp.tanh(h @ w3.T + b3)
    return h @ w4.T + b4


# TODO(synk): jacobian/hessian/batch_* methods of the PyTorch module use
# torch.autograd; they would be jax.jacfwd / jax.hessian over this forward, not
# a separate Pallas kernel, so they are not implemented here.

if __name__ == "__main__":
    key = jax.random.PRNGKey(0)
    pkey, xkey = jax.random.split(key)
    params = init_params(pkey)
    w_stack, b_stack = prepare_params(params)   # done once, reused every call

    batch = 8
    x = jax.random.normal(xkey, (batch, INPUT_DIMS), jnp.float32)

    out = value_network_forward(x, w_stack, b_stack)
    out = jax.block_until_ready(out)

    ref = _reference_forward(x, params)
    assert out.shape == (batch, OUT_DIMS), out.shape
    assert jnp.allclose(out, ref, atol=1e-5, rtol=1e-5), (out, ref)

    print("KERNEL_OK")
</pallas_src>

<mosaic_0001>
module attributes {stable_mosaic.version = 11 : i64} {
  func.func @_mlp_kernel(%arg0: i32, %arg1: memref<8x256xf32, #tpu.memory_space<vmem>>, %arg2: memref<4x128x128xf32, #tpu.memory_space<vmem>>, %arg3: memref<4x128x1xf32, #tpu.memory_space<vmem>>, %arg4: memref<8x256xf32, #tpu.memory_space<vmem>>) attributes {dimension_semantics = [#tpu.dimension_semantics<parallel>], iteration_bounds = array<i64: 1>, scalar_prefetch = 0 : i64, scratch_operands = 0 : i64, tpu.core_type = #tpu.core_type<tc>, window_params = [{transform_indices = @transform_0, window_bounds = array<i64: 8, 256>}, {pipeline_mode = #tpu.pipeline_mode<synchronous>, transform_indices = @transform_1, window_bounds = array<i64: 4, 128, 128>}, {pipeline_mode = #tpu.pipeline_mode<synchronous>, transform_indices = @transform_2, window_bounds = array<i64: 4, 128, 1>}, {transform_indices = @transform_3, window_bounds = array<i64: 8, 256>}]} {
    %c0 = arith.constant 0 : index
    %c0_0 = arith.constant 0 : index
    %0 = vector.load %arg1[%c0, %c0_0] : memref<8x256xf32, #tpu.memory_space<vmem>>, vector<8x256xf32>
    %c0_1 = arith.constant 0 : index
    %c0_2 = arith.constant 0 : index
    %c0_3 = arith.constant 0 : index
    %1 = vector.load %arg2[%c0_1, %c0_2, %c0_3] : memref<4x128x128xf32, #tpu.memory_space<vmem>>, vector<1x128x128xf32>
    %2 = vector.shape_cast %1 : vector<1x128x128xf32> to vector<128x128xf32>
    %c0_4 = arith.constant 0 : index
    %c0_5 = arith.constant 0 : index
    %c0_6 = arith.constant 0 : index
    %3 = vector.load %arg3[%c0_4, %c0_5, %c0_6] : memref<4x128x1xf32, #tpu.memory_space<vmem>>, vector<1x128x1xf32>
    %4 = vector.shape_cast %3 : vector<1x128x1xf32> to vector<128x1xf32>
    %5 = vector.extract_strided_slice %2 {offsets = [0, 0], sizes = [128, 1], strides = [1, 1]} : vector<128x128xf32> to vector<128x1xf32>
    %6 = vector.extract_strided_slice %0 {offsets = [0, 0], sizes = [1, 256], strides = [1, 1]} : vector<8x256xf32> to vector<1x256xf32>
    %7 = vector.broadcast %5 : vector<128x1xf32> to vector<128x256xf32>
    %8 = vector.broadcast %6 : vector<1x256xf32> to vector<128x256xf32>
    %9 = arith.mulf %7, %8 : vector<128x256xf32>
    %10 = vector.broadcast %4 : vector<128x1xf32> to vector<128x256xf32>
    %11 = arith.addf %10, %9 : vector<128x256xf32>
    %12 = vector.extract_strided_slice %2 {offsets = [0, 1], sizes = [128, 1], strides = [1, 1]} : vector<128x128xf32> to vector<128x1xf32>
    %13 = vector.extract_strided_slice %0 {offsets = [1, 0], sizes = [1, 256], strides = [1, 1]} : vector<8x256xf32> to vector<1x256xf32>
    %14 = vector.broadcast %12 : vector<128x1xf32> to vector<128x256xf32>
    %15 = vector.broadcast %13 : vector<1x256xf32> to vector<128x256xf32>
    %16 = arith.mulf %14, %15 : vector<128x256xf32>
    %17 = arith.addf %11, %16 : vector<128x256xf32>
    %18 = vector.extract_strided_slice %2 {offsets = [0, 2], sizes = [128, 1], strides = [1, 1]} : vector<128x128xf32> to vector<128x1xf32>
    %19 = vector.extract_strided_slice %0 {offsets = [2, 0], sizes = [1, 256], strides = [1, 1]} : vector<8x256xf32> to vector<1x256xf32>
    %20 = vector.broadcast %18 : vector<128x1xf32> to vector<128x256xf32>
    %21 = vector.broadcast %19 : vector<1x256xf32> to vector<128x256xf32>
    %22 = arith.mulf %20, %21 : vector<128x256xf32>
    %23 = arith.addf %17, %22 : vector<128x256xf32>
    %24 = math.tanh %23 : vector<128x256xf32>
    %c1 = arith.constant 1 : index
    %c0_7 = arith.constant 0 : index
    %c0_8 = arith.constant 0 : index
    %25 = vector.load %arg2[%c1, %c0_7, %c0_8] : memref<4x128x128xf32, #tpu.memory_space<vmem>>, vector<1x128x128xf32>
    %26 = vector.shape_cast %25 : vector<1x128x128xf32> to vector<128x128xf32>
    %cst = arith.constant dense<0.000000e+00> : vector<128x256xf32>
    %27 = tpu.matmul %26, %24, %cst {dimension_numbers = #tpu.dot_dimension_numbers<[1], [0], [0], [1], [0, 0, 1, 1], [], []>} : vector<128x128xf32>, vector<128x256xf32>, vector<128x256xf32> -> vector<128x256xf32>
    %c1_9 = arith.constant 1 : index
    %c0_10 = arith.constant 0 : index
    %c0_11 = arith.constant 0 : index
    %28 = vector.load %arg3[%c1_9, %c0_10, %c0_11] : memref<4x128x1xf32, #tpu.memory_space<vmem>>, vector<1x128x1xf32>
    %29 = vector.shape_cast %28 : vector<1x128x1xf32> to vector<128x1xf32>
    %30 = vector.broadcast %29 : vector<128x1xf32> to vector<128x256xf32>
    %31 = arith.addf %27, %30 : vector<128x256xf32>
    %32 = math.tanh %31 : vector<128x256xf32>
    %c2 = arith.constant 2 : index
    %c0_12 = arith.constant 0 : index
    %c0_13 = arith.constant 0 : index
    %33 = vector.load %arg2[%c2, %c0_12, %c0_13] : memref<4x128x128xf32, #tpu.memory_space<vmem>>, vector<1x8x128xf32>
    %34 = vector.shape_cast %33 : vector<1x8x128xf32> to vector<8x128xf32>
    %cst_14 = arith.constant dense<0.000000e+00> : vector<8x256xf32>
    %35 = tpu.matmul %34, %32, %cst_14 {dimension_numbers = #tpu.dot_dimension_numbers<[1], [0], [0], [1], [0, 0, 1, 1], [], []>} : vector<8x128xf32>, vector<128x256xf32>, vector<8x256xf32> -> vector<8x256xf32>
    %c2_15 = arith.constant 2 : index
    %c0_16 = arith.constant 0 : index
    %c0_17 = arith.constant 0 : index
    %36 = vector.load %arg3[%c2_15, %c0_16, %c0_17] : memref<4x128x1xf32, #tpu.memory_space<vmem>>, vector<1x8x1xf32>
    %37 = vector.shape_cast %36 : vector<1x8x1xf32> to vector<8x1xf32>
    %38 = vector.broadcast %37 : vector<8x1xf32> to vector<8x256xf32>
    %39 = arith.addf %35, %38 : vector<8x256xf32>
    %40 = math.tanh %39 : vector<8x256xf32>
    %c3 = arith.constant 3 : index
    %c0_18 = arith.constant 0 : index
    %c0_19 = arith.constant 0 : index
    %41 = vector.load %arg2[%c3, %c0_18, %c0_19] : memref<4x128x128xf32, #tpu.memory_space<vmem>>, vector<1x8x1xf32>
    %42 = vector.shape_cast %41 : vector<1x8x1xf32> to vector<8x1xf32>
    %c3_20 = arith.constant 3 : index
    %c0_21 = arith.constant 0 : index
    %c1_22 = arith.constant 1 : index
    %43 = vector.load %arg2[%c3_20, %c0_21, %c1_22] : memref<4x128x128xf32, #tpu.memory_space<vmem>>, vector<1x8x1xf32>
    %44 = vector.shape_cast %43 : vector<1x8x1xf32> to vector<8x1xf32>
    %c3_23 = arith.constant 3 : index
    %c0_24 = arith.constant 0 : index
    %c0_25 = arith.constant 0 : index
    %45 = vector.load %arg3[%c3_23, %c0_24, %c0_25] : memref<4x128x1xf32, #tpu.memory_space<vmem>>, vector<1x8x1xf32>
    %46 = vector.shape_cast %45 : vector<1x8x1xf32> to vector<8x1xf32>
    %47 = vector.extract_strided_slice %40 {offsets = [0, 0], sizes = [1, 256], strides = [1, 1]} : vector<8x256xf32> to vector<1x256xf32>
    %48 = vector.broadcast %42 : vector<8x1xf32> to vector<8x256xf32>
    %49 = vector.broadcast %47 : vector<1x256xf32> to vector<8x256xf32>
    %50 = arith.mulf %48, %49 : vector<8x256xf32>
    %51 = vector.broadcast %46 : vector<8x1xf32> to vector<8x256xf32>
    %52 = arith.addf %51, %50 : vector<8x256xf32>
    %53 = vector.extract_strided_slice %40 {offsets = [1, 0], sizes = [1, 256], strides = [1, 1]} : vector<8x256xf32> to vector<1x256xf32>
    %54 = vector.broadcast %44 : vector<8x1xf32> to vector<8x256xf32>
    %55 = vector.broadcast %53 : vector<1x256xf32> to vector<8x256xf32>
    %56 = arith.mulf %54, %55 : vector<8x256xf32>
    %57 = arith.addf %52, %56 : vector<8x256xf32>
    %c0_26 = arith.constant 0 : index
    %c0_27 = arith.constant 0 : index
    %58 = vector.load %arg4[%c0_26, %c0_27] : memref<8x256xf32, #tpu.memory_space<vmem>>, vector<8x256xf32>
    tpu.vector_store %arg4[%c0_26, %c0_27], %57 {strides = array<i32>} : memref<8x256xf32, #tpu.memory_space<vmem>>, vector<8x256xf32>,
    return
  }
  func.func @transform_0(%arg0: i32) -> (i32, i32) {
    %c0_i32 = arith.constant 0 : i32
    %c0_i32_0 = arith.constant 0 : i32
    return %c0_i32, %arg0 : i32, i32
  }
  func.func @transform_1(%arg0: i32) -> (i32, i32, i32) {
    %c0_i32 = arith.constant 0 : i32
    %c0_i32_0 = arith.constant 0 : i32
    %c0_i32_1 = arith.constant 0 : i32
    %c0_i32_2 = arith.constant 0 : i32
    return %c0_i32, %c0_i32_0, %c0_i32_1 : i32, i32, i32
  }
  func.func @transform_2(%arg0: i32) -> (i32, i32, i32) {
    %c0_i32 = arith.constant 0 : i32
    %c0_i32_0 = arith.constant 0 : i32
    %c0_i32_1 = arith.constant 0 : i32
    %c0_i32_2 = arith.constant 0 : i32
    return %c0_i32, %c0_i32_0, %c0_i32_1 : i32, i32, i32
  }
  func.func @transform_3(%arg0: i32) -> (i32, i32) {
    %c0_i32 = arith.constant 0 : i32
    %c0_i32_0 = arith.constant 0 : i32
    return %c0_i32, %arg0 : i32, i32
  }
}

</mosaic_0001>

<bundles_post_ra>
// kernel: value_network_forward.1
= control target key start
LH: loop header
LB: loop body
LE: loop exit
PB: predicated region body
PF: predicated region fallthrough
CT: control target
= control target key end

     0   :  { %v1294_v0 = vmov 0   ;;  %v1295_v6 = vmov 1   ;;  %v1296_v11 = vmov 2   ;;  %v128_v53 = vlaneseq  ;;  %s1839_s2 = inlined_call_operand.vmem [shape: f32[4,128,1], index: 2, kind: input, shape index: {}]   ;;  %s1840_s1 = inlined_call_operand.vmem [shape: f32[4,128,128], index: 1, kind: input, shape index: {}]   ;;  %s1841_s0 = inlined_call_operand.vmem [shape: f32[8,256], index: 0, kind: input, shape index: {}]   ;;  %s1842_s3 = inlined_call_operand.vmem [shape: f32[8,256], index: 3, kind: output, shape index: {}]  }
   0x1   :  { %1126 = vset.pattern.permute.xlu1 %v1294_v0  ;;  %1125 = vset.pattern.permute.xlu0 %v1294_v0  ;;  %v32_v1 = vld [vmem:[%s1839_s2] sm:$0xff]  ;;  %v33_v3 = vld [vmem:[%s1839_s2 + $0x8] sm:$0xff]  ;;  %v19_v5 = vld [vmem:[%s1840_s1 + $0x18] sm:$0xff] }
   0x2   :  { %v1326_v2 = vld [vmem:[%s1840_s1] sm:$0xff]  ;;  %170 = vperm.xlu1 %1126, %v32_v1   ;;  %v17_v4 = vld [vmem:[%s1840_s1 + $0x8] sm:$0xff]  ;;  %v34_v7 = vld [vmem:[%s1839_s2 + $0x10] sm:$0xff]  ;;  %v129_v56 = vshrl.u32 %v128_v53, 7 }
   0x3   :  { %50 = vperm.xlu0 %1125, %v1326_v2   ;;  %v18_v8 = vld [vmem:[%s1840_s1 + $0x10] sm:$0xff]  ;;  %v21_v9 = vld [vmem:[%s1840_s1 + $0x28] sm:$0xff]  ;;  %v36_v10 = vld [vmem:[%s1839_s2 + $0x20] sm:$0xff] }
   0x4   :  { %v1357_v12 = vld [vmem:[%s1840_s1 + $0x38] sm:$0xff]  ;;  %v38_v14 = vld [vmem:[%s1839_s2 + $0x30] sm:$0xff]  ;;  %v1370_v15 = vld [vmem:[%s1840_s1 + $0x48] sm:$0xff]  ;;  %v1516_v59 = vsub.s32 0, %v129_v56  ;;  %v1518_v60 = vsub.s32 1, %v129_v56 }
   0x5   :  { %v35_v13 = vld [vmem:[%s1839_s2 + $0x18] sm:$0xff]  ;;  %v40_v16 = vld [vmem:[%s1839_s2 + $0x40] sm:$0xff]  ;;  %v42_v19 = vld [vmem:[%s1839_s2 + $0x50] sm:$0xff] }
   0x6   :  { %175 = vperm.xlu1 %1126, %v33_v3   ;;  %v20_v17 = vld [vmem:[%s1840_s1 + $0x20] sm:$0xff]  ;;  %v1384_v18 = vld [vmem:[%s1840_s1 + $0x58] sm:$0xff]  ;;  %v1394_v20 = vld [vmem:[%s1840_s1 + $0x68] sm:$0xff] }
   0x7   :  { %55 = vperm.xlu0 %1125, %v17_v4   ;;  %v37_v21 = vld [vmem:[%s1839_s2 + $0x28] sm:$0xff]  ;;  %v44_v22 = vld [vmem:[%s1839_s2 + $0x60] sm:$0xff]  ;;  %v1407_v23 = vld [vmem:[%s1840_s1 + $0x78] sm:$0xff] }
   0x8   :  { %v46_v24 = vld [vmem:[%s1839_s2 + $0x70] sm:$0xff]  ;;  %v39_v26 = vld [vmem:[%s1839_s2 + $0x38] sm:$0xff]  ;;  %v24_v27 = vld [vmem:[%s1840_s1 + $0x40] sm:$0xff] }
   0x9   :  { %v22_v25 = vld [vmem:[%s1840_s1 + $0x30] sm:$0xff]  ;;  %v28_v29 = vld [vmem:[%s1840_s1 + $0x60] sm:$0xff]  ;;  %v41_v31 = vld [vmem:[%s1839_s2 + $0x48] sm:$0xff] }
   0xa   :  { %1127 = vset.pattern.permute.xlu1 %v1295_v6  ;;  %v26_v28 = vld [vmem:[%s1840_s1 + $0x50] sm:$0xff]  ;;  %v43_v32 = vld [vmem:[%s1839_s2 + $0x58] sm:$0xff]  ;;  %v45_v42 = vld [vmem:[%s1839_s2 + $0x68] sm:$0xff] }
   0xb   :  { %65 = vperm.xlu0 %1125, %v19_v5   ;;  %285 = vperm.xlu1 %1127, %v17_v4   ;;  %v1441_v30 = vld [vmem:[%s1840_s1 + $0x70] sm:$0xff]  ;;  %v47_v55 = vld [vmem:[%s1839_s2 + $0x78] sm:$0xff]  ;;  %v14_v62 = vld [vmem:[%s1841_s0] sm:$0xff] }
   0xc   :  { %v15_v1 = vld [vmem:[%s1841_s0 + $0x8] sm:$0xff]  ;;  %v1534_v3 = vrot.slane %v14_v62, %v1518_v60 }
   0xf   :  { %180 = vperm.xlu0 %1125, %v34_v7   ;;  %1128 = vset.pattern.permute.xlu1 %v1294_v0  ;;  %v1540_v7 = vrot.slane %v15_v1, %v1518_v60 }
  0x10   :  { %60 = vperm.xlu1 %1128, %v18_v8  }
  0x13   :  { %75 = vperm.xlu0 %1125, %v21_v9  }
  0x14   :  { %1129 = vset.pattern.permute.xlu1 %v1296_v11 }
  0x15   :  { %417 = vperm.xlu1 %1129, %v1326_v2  }
  0x17   :  { %190 = vperm.xlu0 %1125, %v36_v10  }
  0x19   :  { %421 = vperm.xlu1 %1129, %v17_v4   ;;  %v482_v4 = vsub.s32 2, %v129_v56 }
  0x1b   :  { %85 = vperm.xlu0 %1125, %v1357_v12  }
  0x1d   :  { %1130 = vset.pattern.permute.xlu1 %v1294_v0 }
  0x1e   :  { %185 = vperm.xlu1 %1130, %v35_v13  }
  0x1f   :  { %200 = vperm.xlu0 %1125, %v38_v14   ;;  %v1550_v14 = vrot.slane %v14_v62, %v482_v4 }
  0x22   :  { %1131 = vset.pattern.permute.xlu1 %v1295_v6 }
  0x23   :  { %95 = vperm.xlu0 %1125, %v1370_v15   ;;  %293 = vperm.xlu1 %1131, %v19_v5  }
  0x27   :  { %210 = vperm.xlu0 %1125, %v40_v16   ;;  %1132 = vset.pattern.permute.xlu1 %v1294_v0  ;;  %v1554_v16 = vrot.slane %v15_v1, %v482_v4 }
  0x28   :  { %70 = vperm.xlu1 %1132, %v20_v17  }
  0x2b   :  { %105 = vperm.xlu0 %1125, %v1384_v18  }
  0x2c   :  { %1133 = vset.pattern.permute.xlu1 %v1296_v11 }
  0x2d   :  { %425 = vperm.xlu1 %1133, %v18_v8  }
  0x2f   :  { %220 = vperm.xlu0 %1125, %v42_v19  }
  0x31   :  { %429 = vperm.xlu1 %1133, %v19_v5   ;;  %v1537_v5 = vrot.slane %v15_v1, %v1516_v59 }
  0x33   :  { %115 = vperm.xlu0 %1125, %v1394_v20  }
  0x35   :  { %1134 = vset.pattern.permute.xlu1 %v1294_v0 }
  0x36   :  { %195 = vperm.xlu1 %1134, %v37_v21  }
  0x37   :  { %230 = vperm.xlu0 %1125, %v44_v22  }
  0x3a   :  { %1135 = vset.pattern.permute.xlu1 %v1295_v6 }
  0x3b   :  { %125 = vperm.xlu0 %1125, %v1407_v23   ;;  %301 = vperm.xlu1 %1135, %v21_v9  }
  0x3f   :  { %240 = vperm.xlu0 %1125, %v46_v24   ;;  %1136 = vset.pattern.permute.xlu1 %v1294_v0 }
  0x40   :  { %80 = vperm.xlu1 %1136, %v22_v25  }
  0x43   :  { %1154 = vset.pattern.permute.xlu0 %v1295_v6 }
  0x44   :  { %281 = vperm.xlu0 %1154, %v1326_v2   ;;  %1137 = vset.pattern.permute.xlu1 %v1296_v11  ;;  %v1531_v2 = vrot.slane %v14_v62, %v1516_v59 }
  0x45   :  { %433 = vperm.xlu1 %1137, %v20_v17  }
  0x48   :  { %289 = vperm.xlu0 %1154, %v18_v8  }
  0x49   :  { %437 = vperm.xlu1 %1137, %v21_v9  }
  0x4c   :  { %297 = vperm.xlu0 %1154, %v20_v17  }
  0x4d   :  { %1138 = vset.pattern.permute.xlu1 %v1294_v0 }
  0x4e   :  { %205 = vperm.xlu1 %1138, %v39_v26  }
  0x50   :  { %305 = vperm.xlu0 %1154, %v22_v25  }
  0x52   :  { %1139 = vset.pattern.permute.xlu1 %v1295_v6 }
  0x53   :  { %309 = vperm.xlu1 %1139, %v1357_v12  }
  0x54   :  { %313 = vperm.xlu0 %1154, %v24_v27  }
  0x57   :  { %1140 = vset.pattern.permute.xlu1 %v1294_v0 }
  0x58   :  { %321 = vperm.xlu0 %1154, %v26_v28   ;;  %90 = vperm.xlu1 %1140, %v24_v27  }
  0x5c   :  { %329 = vperm.xlu0 %1154, %v28_v29   ;;  %1141 = vset.pattern.permute.xlu1 %v1296_v11 }
  0x5d   :  { %441 = vperm.xlu1 %1141, %v22_v25  }
  0x60   :  { %337 = vperm.xlu0 %1154, %v1441_v30  }
  0x61   :  { %445 = vperm.xlu1 %1141, %v1357_v12  }
  0x64   :  { %1158 = vset.pattern.permute.xlu0 %v1296_v11 }
  0x65   :  { %477 = vperm.xlu0 %1158, %v1407_v23   ;;  %1142 = vset.pattern.permute.xlu1 %v1294_v0 }
  0x66   :  { %215 = vperm.xlu1 %1142, %v41_v31  }
  0x69   :  { %1160 = vset.pattern.permute.xlu0 %v1294_v0 }
  0x6a   :  { %1143 = vset.pattern.permute.xlu1 %v1295_v6 }
  0x6b   :  { %317 = vperm.xlu1 %1143, %v1370_v15  }
  0x6f   :  { %1144 = vset.pattern.permute.xlu1 %v1294_v0 }
  0x70   :  { %100 = vperm.xlu1 %1144, %v26_v28  }
  0x74   :  { %1145 = vset.pattern.permute.xlu1 %v1296_v11 }
  0x75   :  { %449 = vperm.xlu1 %1145, %v24_v27  }
  0x79   :  { %453 = vperm.xlu1 %1145, %v1370_v15  }
  0x7d   :  { %1146 = vset.pattern.permute.xlu1 %v1294_v0 }
  0x7e   :  { %225 = vperm.xlu1 %1146, %v43_v32  }
  0x81   :  { %v1461_v33 = vpop.permute.xlu1 %170 }
  0x82   :  { %v1463_v34 = vpop.permute.xlu0 %50  ;;  %1147 = vset.pattern.permute.xlu1 %v1295_v6 }
  0x83   :  { %325 = vperm.xlu1 %1147, %v1384_v18   ;;  %v137_v21 = vmul.f32 %v1537_v5, %v1463_v34 }
  0x85   :  { %v1467_v35 = vpop.permute.xlu1 %175 }
  0x86   :  { %v56_v36 = vpop.permute.xlu0 %55 }
  0x87   :  { %1148 = vset.pattern.permute.xlu1 %v1294_v0  ;;  %v138_v10 = vmul.f32 %v1531_v2, %v56_v36  ;;  %v139_v12 = vmul.f32 %v1537_v5, %v56_v36 }
  0x88   :  { %110 = vperm.xlu1 %1148, %v28_v29  }
  0x89   :  { %v251_v22 = vadd.f32 %v1467_v35, %v139_v12 }
  0x8a   :  { %v1470_v37 = vpop.permute.xlu0 %65  ;;  %v286_v38 = vpop.permute.xlu1 %285 }
  0x8b   :  { %v354_v13 = vmul.f32 %v1534_v3, %v286_v38  ;;  %v355_v15 = vmul.f32 %v1540_v7, %v286_v38  ;;  %v142_v25 = vmul.f32 %v1531_v2, %v1470_v37 }
  0x8c   :  { %1149 = vset.pattern.permute.xlu1 %v1296_v11 }
  0x8d   :  { %457 = vperm.xlu1 %1149, %v26_v28   ;;  %v387_v27 = vadd.f32 %v355_v15, %v251_v22 }
  0x8e   :  { %v1473_v39 = vpop.permute.xlu0 %180 }
  0x8f   :  { %v1475_v40 = vpop.permute.xlu1 %60 }
  0x90   :  { %v140_v26 = vmul.f32 %v1531_v2, %v1475_v40  ;;  %v141_v28 = vmul.f32 %v1537_v5, %v1475_v40 }
  0x91   :  { %461 = vperm.xlu1 %1149, %v1384_v18   ;;  %v250_v18 = vadd.f32 %v1467_v35, %v138_v10  ;;  %v249_v35 = vadd.f32 %v1461_v33, %v137_v21 }
  0x92   :  { %v1478_v41 = vpop.permute.xlu0 %75 }
  0x93   :  { %v386_v24 = vadd.f32 %v354_v13, %v250_v18  ;;  %v146_v53 = vmul.f32 %v1531_v2, %v1478_v41 }
  0x94   :  { %v1483_v43 = vpop.permute.xlu1 %417 }
  0x95   :  { %1150 = vset.pattern.permute.xlu1 %v1294_v0  ;;  %v488_v56 = vmul.f32 %v1550_v14, %v1483_v43 }
  0x96   :  { %v1486_v44 = vpop.permute.xlu0 %190  ;;  %235 = vperm.xlu1 %1150, %v45_v42  }
  0x98   :  { %v422_v45 = vpop.permute.xlu1 %421 }
  0x99   :  { %v490_v19 = vmul.f32 %v1550_v14, %v422_v45 }
  0x9a   :  { %v1488_v46 = vpop.permute.xlu0 %85  ;;  %1151 = vset.pattern.permute.xlu1 %v1295_v6 }
  0x9b   :  { %333 = vperm.xlu1 %1151, %v1394_v20   ;;  %v522_v31 = vadd.f32 %v490_v19, %v386_v24 }
  0x9d   :  { %v1492_v47 = vpop.permute.xlu1 %185  ;;  %1162 = vtanh.f32 %v522_v31 }
  0x9e   :  { %v1494_v48 = vpop.permute.xlu0 %200  ;;  %v254_v42 = vadd.f32 %v1492_v47, %v142_v25 }
  0x9f   :  { %1152 = vset.pattern.permute.xlu1 %v1294_v0 }
  0xa0   :  { %120 = vperm.xlu1 %1152, %v1441_v30  }
  0xa2   :  { %v1498_v49 = vpop.permute.xlu0 %95  ;;  %v294_v50 = vpop.permute.xlu1 %293 }
  0xa3   :  { %v358_v32 = vmul.f32 %v1534_v3, %v294_v50  ;;  %v359_v40 = vmul.f32 %v1540_v7, %v294_v50 }
  0xa4   :  { %1153 = vset.pattern.permute.xlu1 %v1296_v11 }
  0xa5   :  { %465 = vperm.xlu1 %1153, %v28_v29   ;;  %v390_v50 = vadd.f32 %v358_v32, %v254_v42 }
  0xa6   :  { %v1501_v51 = vpop.permute.xlu0 %210 }
  0xa7   :  { %v1503_v52 = vpop.permute.xlu1 %70 }
  0xa9   :  { %469 = vperm.xlu1 %1153, %v1394_v20  }
  0xaa   :  { %v1506_v54 = vpop.permute.xlu0 %105 }
  0xac   :  { %v1511_v57 = vpop.permute.xlu1 %425 }
  0xad   :  { %1155 = vset.pattern.permute.xlu1 %v1294_v0  ;;  %v493_v22 = vmul.f32 %v1554_v16, %v1511_v57 }
  0xae   :  { %v1514_v58 = vpop.permute.xlu0 %220  ;;  %245 = vperm.xlu1 %1155, %v47_v55   ;;  %v147_v55 = vmul.f32 %v1537_v5, %v1478_v41 }
  0xb0   :  { %v430_v61 = vpop.permute.xlu1 %429 }
  0xb1   :  { %v495_v12 = vmul.f32 %v1554_v16, %v430_v61 }
  0xb2   :  { %v1523_v63 = vpop.permute.xlu0 %115  ;;  %1156 = vset.pattern.permute.xlu1 %v1295_v6 }
  0xb3   :  { %341 = vperm.xlu1 %1156, %v1407_v23   ;;  %v491_v23 = vmul.f32 %v1554_v16, %v422_v45  ;;  %v494_v45 = vmul.f32 %v1550_v14, %v430_v61 }
  0xb5   :  { %v1542_v8 = vpop.permute.xlu1 %195  ;;  %v523_v36 = vadd.f32 %v491_v23, %v387_v27  ;;  %v526_v13 = vadd.f32 %v494_v45, %v390_v50 }
  0xb6   :  { %v1544_v9 = vpop.permute.xlu0 %230  ;;  %v258_v23 = vadd.f32 %v1542_v8, %v146_v53 }
  0xb7   :  { %1157 = vset.pattern.permute.xlu1 %v1296_v11  ;;  %v136_v11 = vmul.f32 %v1531_v2, %v1463_v34  ;;  %1164 = vtanh.f32 %v523_v36 }
  0xb8   :  { %473 = vperm.xlu1 %1157, %v1441_v30   ;;  %v143_v30 = vmul.f32 %v1537_v5, %v1470_v37  ;;  %v253_v37 = vadd.f32 %v1473_v39, %v141_v28  ;;  %1166 = vtanh.f32 %v526_v13 }
  0xb9   :  { %v248_v34 = vadd.f32 %v1461_v33, %v136_v11  ;;  %v144_v33 = vmul.f32 %v1531_v2, %v1503_v52 }
  0xba   :  { %v1556_v17 = vpop.permute.xlu0 %125  ;;  %v302_v20 = vpop.permute.xlu1 %301  ;;  %v255_v62 = vadd.f32 %v1492_v47, %v143_v30  ;;  %v145_v47 = vmul.f32 %v1537_v5, %v1503_v52  ;;  %v259_v30 = vadd.f32 %v1542_v8, %v147_v55 }
  0xbb   :  { %v362_v15 = vmul.f32 %v1534_v3, %v302_v20  ;;  %v256_v19 = vadd.f32 %v1486_v44, %v144_v33  ;;  %v363_v61 = vmul.f32 %v1540_v7, %v302_v20  ;;  %v1163_v8 = vpop.eup %1162 }
  0xbc   :  { %1159 = vset.pattern.permute.xlu1 %v1294_v0  ;;  %v252_v0 = vadd.f32 %v1473_v39, %v140_v26  ;;  %v489_v39 = vmul.f32 %v1554_v16, %v1483_v43  ;;  %v391_v41 = vadd.f32 %v359_v40, %v255_v62  ;;  %v492_v43 = vmul.f32 %v1550_v14, %v1511_v57 }
  0xbd   :  { %v394_v31 = vadd.f32 %v362_v15, %v258_v23  ;;  %v257_v20 = vadd.f32 %v1486_v44, %v145_v47  ;;  %v395_v36 = vadd.f32 %v363_v61, %v259_v30 }
  0xbe   :  { %v1573_v29 = vpop.permute.xlu0 %240  ;;  %v527_v28 = vadd.f32 %v495_v12, %v391_v41 }
  0xbf   :  { %v1580_v38 = vpop.permute.xlu1 %80 }
  0xc3   :  { %v282_v1 = vpop.permute.xlu0 %281 }
  0xc4   :  { %v352_v4 = vmul.f32 %v1534_v3, %v282_v1  ;;  %v353_v10 = vmul.f32 %v1540_v7, %v282_v1  ;;  %v434_v18 = vpop.permute.xlu1 %433  ;;  %v1297_v1 = vmov 0.0  }
  0xc5   :  { %v496_v62 = vmul.f32 %v1550_v14, %v434_v18  ;;  %762 = vmatprep.mubr.f32.mxu0 %v1297_v1  ;;  %964 = vmatprep.mubr.f32.mxu1 %v1297_v1 }
  0xc6   :  { %v384_v11 = vadd.f32 %v352_v4, %v248_v34  ;;  %v385_v21 = vadd.f32 %v353_v10, %v249_v35 }
  0xc7   :  { %v290_v24 = vpop.permute.xlu0 %289 }
  0xc8   :  { %v520_v25 = vadd.f32 %v488_v56, %v384_v11  ;;  %v521_v26 = vadd.f32 %v489_v39, %v385_v21  ;;  %v356_v27 = vmul.f32 %v1534_v3, %v290_v24  ;;  %v357_v52 = vmul.f32 %v1540_v7, %v290_v24  ;;  %v438_v32 = vpop.permute.xlu1 %437 }
  0xc9   :  { %v498_v35 = vmul.f32 %v1550_v14, %v438_v32  ;;  %v499_v42 = vmul.f32 %v1554_v16, %v438_v32  ;;  %v497_v39 = vmul.f32 %v1554_v16, %v434_v18  ;;  %v149_v24 = vmul.f32 %v1537_v5, %v1580_v38 }
  0xca   :  { %1168 = vtanh.f32 %v520_v25  ;;  %v388_v34 = vadd.f32 %v356_v27, %v252_v0  ;;  %v389_v57 = vadd.f32 %v357_v52, %v253_v37  ;;  %v1165_v37 = vpop.eup %1164 }
  0xcb   :  { %1170 = vtanh.f32 %v521_v26  ;;  %v298_v40 = vpop.permute.xlu0 %297  ;;  %v530_v33 = vadd.f32 %v498_v35, %v394_v31  ;;  %v531_v55 = vadd.f32 %v499_v42, %v395_v36  ;;  %v1167_v12 = vpop.eup %1166  ;;  %v261_v35 = vadd.f32 %v1494_v48, %v149_v24 }
  0xcc   :  { %v524_v45 = vadd.f32 %v492_v43, %v388_v34  ;;  %v525_v53 = vadd.f32 %v493_v22, %v389_v57  ;;  %v360_v56 = vmul.f32 %v1534_v3, %v298_v40  ;;  %1172 = vtanh.f32 %v527_v28 }
  0xcd   :  { %v361_v0 = vmul.f32 %v1540_v7, %v298_v40  ;;  %v206_v50 = vpop.permute.xlu1 %205  ;;  %v148_v22 = vmul.f32 %v1531_v2, %v1580_v38  ;;  %v150_v34 = vmul.f32 %v1531_v2, %v1488_v46  ;;  %v151_v57 = vmul.f32 %v1537_v5, %v1488_v46 }
  0xce   :  { %1174 = vtanh.f32 %v524_v45  ;;  %v392_v44 = vadd.f32 %v360_v56, %v256_v19 }
  0xcf   :  { %1176 = vtanh.f32 %v525_v53  ;;  %v393_v4 = vadd.f32 %v361_v0, %v257_v20  ;;  %v306_v11 = vpop.permute.xlu0 %305  ;;  %v260_v30 = vadd.f32 %v1494_v48, %v148_v22  ;;  %v263_v46 = vadd.f32 %v206_v50, %v151_v57 }
  0xd0   :  { %1178 = vtanh.f32 %v530_v33  ;;  %v528_v10 = vadd.f32 %v496_v62, %v392_v44  ;;  %v364_v25 = vmul.f32 %v1534_v3, %v306_v11  ;;  %v365_v31 = vmul.f32 %v1540_v7, %v306_v11 }
  0xd1   :  { %1180 = vtanh.f32 %v531_v55  ;;  %v529_v41 = vadd.f32 %v497_v39, %v393_v4  ;;  %v262_v55 = vadd.f32 %v206_v50, %v150_v34 }
  0xd2   :  { %1182 = vtanh.f32 %v528_v10  ;;  %v310_v13 = vpop.permute.xlu1 %309  ;;  %v396_v20 = vadd.f32 %v364_v25, %v260_v30 }
  0xd3   :  { %1184 = vtanh.f32 %v529_v41  ;;  %v366_v36 = vmul.f32 %v1534_v3, %v310_v13  ;;  %v367_v45 = vmul.f32 %v1540_v7, %v310_v13 }
  0xd4   :  { %v1169_v15 = vpop.eup %1168 }
  0xd5   :  { %v1171_v47 = vpop.eup %1170  ;;  %v1059_v19 = vpack.c.bf16 %v1163_v8, %v1169_v15  ;;  %v397_v8 = vadd.f32 %v365_v31, %v261_v35  ;;  %v398_v62 = vadd.f32 %v366_v36, %v262_v55  ;;  %v399_v44 = vadd.f32 %v367_v45, %v263_v46 }
  0xd6   :  { %v1057_v21 = vpack.c.bf16 %v1165_v37, %v1171_v47  ;;  %v1173_v43 = vpop.eup %1172  ;;  %v314_v47 = vpop.permute.xlu0 %313 }
  0xd7   :  { %v91_v23 = vpop.permute.xlu1 %90 }
  0xd8   :  { %v1175_v18 = vpop.eup %1174  ;;  %1058 = vmatprep.subr.bf16.mxu0 %v1057_v21  ;;  %v152_v50 = vmul.f32 %v1531_v2, %v91_v23  ;;  %v153_v11 = vmul.f32 %v1537_v5, %v91_v23  ;;  %v155_v23 = vmul.f32 %v1537_v5, %v1498_v49 }
  0xd9   :  { %v1177_v61 = vpop.eup %1176  ;;  %1060 = vmatpush1.bf16.msra.mxu0 %v1059_v19  ;;  %v1063_v26 = vpack.c.bf16 %v1167_v12, %v1175_v18 }
  0xda   :  { %v1179_v27 = vpop.eup %1178  ;;  %v1061_v52 = vpack.c.bf16 %v1173_v43, %v1177_v61  ;;  %v264_v18 = vadd.f32 %v1501_v51, %v152_v50  ;;  %v368_v61 = vmul.f32 %v1534_v3, %v314_v47 }
  0xdb   :  { %v1181_v28 = vpop.eup %1180 }
  0xdc   :  { %v1183_v32 = vpop.eup %1182  ;;  %1062 = vmatprep.subr.bf16.mxu0 %v1061_v52  ;;  %v442_v42 = vpop.permute.xlu1 %441  ;;  %v154_v52 = vmul.f32 %v1531_v2, %v1498_v49 }
  0xdd   :  { %v1185_v38 = vpop.eup %1184  ;;  %1064 = vmatpush1.bf16.msra.mxu0 %v1063_v26  ;;  %v1067_v40 = vpack.c.bf16 %v1179_v27, %v1183_v32  ;;  %v500_v53 = vmul.f32 %v1550_v14, %v442_v42  ;;  %v501_v33 = vmul.f32 %v1554_v16, %v442_v42  ;;  %v265_v26 = vadd.f32 %v1501_v51, %v153_v11 }
  0xde   :  { %v1065_v56 = vpack.c.bf16 %v1181_v28, %v1185_v38  ;;  %v369_v27 = vmul.f32 %v1540_v7, %v314_v47  ;;  %v400_v28 = vadd.f32 %v368_v61, %v264_v18  ;;  %v1037_v47 = vld [vmem:[%s1839_s2 + $0x80] sm:$0xff]  ;;  %v158_v11 = vmul.f32 %v1531_v2, %v1506_v54 }
  0xdf   :  { %v532_v0 = vadd.f32 %v500_v53, %v396_v20  ;;  %v533_v37 = vadd.f32 %v501_v33, %v397_v8  ;;  %620 = vperm.xlu1 %1159, %v1037_v47   ;;  %v162_v47 = vmul.f32 %v1531_v2, %v1523_v63 }
  0xe0   :  { %1066 = vmatprep.subr.bf16.mxu0 %v1065_v56  ;;  %v446_v48 = vpop.permute.xlu1 %445  ;;  %v401_v57 = vadd.f32 %v369_v27, %v265_v26 }
  0xe1   :  { %1068 = vmatpush1.bf16.msra.mxu0 %v1067_v40  ;;  %v502_v39 = vmul.f32 %v1550_v14, %v446_v48  ;;  %v503_v4 = vmul.f32 %v1554_v16, %v446_v48  ;;  %1186 = vtanh.f32 %v532_v0 }
  0xe2   :  { %1188 = vtanh.f32 %v533_v37  ;;  %v322_v37 = vpop.permute.xlu0 %321 }
  0xe3   :  { %v534_v10 = vadd.f32 %v502_v39, %v398_v62  ;;  %v535_v41 = vadd.f32 %v503_v4, %v399_v44 }
  0xe5   :  { %1190 = vtanh.f32 %v534_v10  ;;  %v216_v12 = vpop.permute.xlu1 %215 }
  0xe6   :  { %1192 = vtanh.f32 %v535_v41  ;;  %v266_v38 = vadd.f32 %v216_v12, %v154_v52  ;;  %v267_v35 = vadd.f32 %v216_v12, %v155_v23  ;;  %v372_v41 = vmul.f32 %v1534_v3, %v322_v37 }
  0xea   :  { %v318_v13 = vpop.permute.xlu1 %317 }
  0xeb   :  { %v1187_v15 = vpop.eup %1186  ;;  %v370_v31 = vmul.f32 %v1534_v3, %v318_v13  ;;  %v371_v32 = vmul.f32 %v1540_v7, %v318_v13 }
  0xec   :  { %v1189_v19 = vpop.eup %1188 }
  0xed   :  { %v402_v40 = vadd.f32 %v370_v31, %v266_v38  ;;  %v403_v45 = vadd.f32 %v371_v32, %v267_v35  ;;  %v1040_v31 = vld [vmem:[%s1839_s2 + $0x98] sm:$0xff] }
  0xee   :  { %v1044_v38 = vld [vmem:[%s1839_s2 + $0xb8] sm:$0xff] }
  0xef   :  { %v1191_v21 = vpop.eup %1190  ;;  %v101_v43 = vpop.permute.xlu1 %100 }
  0xf0   :  { %v1193_v22 = vpop.eup %1192  ;;  %v1071_v24 = vpack.c.bf16 %v1191_v21, %v1187_v15  ;;  %v156_v46 = vmul.f32 %v1531_v2, %v101_v43  ;;  %v157_v62 = vmul.f32 %v1537_v5, %v101_v43  ;;  %v373_v15 = vmul.f32 %v1540_v7, %v322_v37 }
  0xf1   :  { %v1069_v25 = vpack.c.bf16 %v1193_v22, %v1189_v19  ;;  %v1039_v19 = vld [vmem:[%s1839_s2 + $0x90] sm:$0xff]  ;;  %v159_v21 = vmul.f32 %v1537_v5, %v1506_v54  ;;  %v1038_v22 = vld [vmem:[%s1839_s2 + $0x88] sm:$0xff] }
  0xf2   :  { %v268_v10 = vadd.f32 %v1514_v58, %v156_v46  ;;  %v269_v50 = vadd.f32 %v1514_v58, %v157_v62  ;;  %630 = vperm.xlu0 %1160, %v1039_v19   ;;  %v1042_v54 = vld [vmem:[%s1839_s2 + $0xa8] sm:$0xff]  ;;  %625 = vperm.xlu1 %1159, %v1038_v22   ;;  %v163_v19 = vmul.f32 %v1537_v5, %v1523_v63  ;;  %v1055_v63 = vld [vmem:[%s1840_s1 + $0x180] sm:$0xff] }
  0xf3   :  { %1070 = vmatprep.subr.bf16.mxu0 %v1069_v25  ;;  %v1050_v46 = vld [vmem:[%s1839_s2 + $0xe8] sm:$0xff] }
  0xf4   :  { %1072 = vmatpush1.bf16.msra.mxu0 %v1071_v24  ;;  %v450_v30 = vpop.permute.xlu1 %449  ;;  %v404_v43 = vadd.f32 %v372_v41, %v268_v10  ;;  %v405_v26 = vadd.f32 %v373_v15, %v269_v50  ;;  %v1052_v50 = vld [vmem:[%s1839_s2 + $0xf8] sm:$0xff] }
  0xf5   :  { %v504_v34 = vmul.f32 %v1550_v14, %v450_v30  ;;  %v505_v51 = vmul.f32 %v1554_v16, %v450_v30 }
  0xf6   :  { %645 = vperm.xlu0 %1160, %v1042_v54   ;;  %635 = vperm.xlu1 %1159, %v1040_v31  }
  0xf7   :  { %v536_v20 = vadd.f32 %v504_v34, %v400_v28  ;;  %v537_v36 = vadd.f32 %v505_v51, %v401_v57 }
  0xf8   :  { %v454_v42 = vpop.permute.xlu1 %453 }
  0xf9   :  { %v506_v49 = vmul.f32 %v1550_v14, %v454_v42  ;;  %v507_v53 = vmul.f32 %v1554_v16, %v454_v42  ;;  %1194 = vtanh.f32 %v536_v20 }
  0xfa   :  { %1196 = vtanh.f32 %v537_v36  ;;  %v1041_v36 = vld [vmem:[%s1839_s2 + $0xa0] sm:$0xff]  ;;  %655 = vperm.xlu0 %1160, %v1044_v38  }
  0xfb   :  { %v538_v33 = vadd.f32 %v506_v49, %v402_v40  ;;  %v539_v56 = vadd.f32 %v507_v53, %v403_v45  ;;  %v1046_v40 = vld [vmem:[%s1839_s2 + $0xc8] sm:$0xff]  ;;  %640 = vperm.xlu1 %1159, %v1041_v36   ;;  %v1043_v45 = vld [vmem:[%s1839_s2 + $0xb0] sm:$0xff]  ;;  %v1048_v49 = vld [vmem:[%s1839_s2 + $0xd8] sm:$0xff] }
  0xfd   :  { %1198 = vtanh.f32 %v538_v33  ;;  %v226_v8 = vpop.permute.xlu1 %225 }
  0xfe   :  { %1200 = vtanh.f32 %v539_v56  ;;  %v270_v27 = vadd.f32 %v226_v8, %v158_v11  ;;  %v271_v52 = vadd.f32 %v226_v8, %v159_v21  ;;  %665 = vperm.xlu0 %1160, %v1046_v40   ;;  %v1045_v56 = vld [vmem:[%s1839_s2 + $0xc0] sm:$0xff]  ;;  %v166_v40 = vmul.f32 %v1531_v2, %v1556_v17 }
  0xff   :  { %650 = vperm.xlu1 %1159, %v1043_v45  }
 0x102   :  { %v326_v55 = vpop.permute.xlu1 %325  ;;  %675 = vperm.xlu0 %1160, %v1048_v49  }
 0x103   :  { %v1195_v0 = vpop.eup %1194  ;;  %v374_v18 = vmul.f32 %v1534_v3, %v326_v55  ;;  %v375_v61 = vmul.f32 %v1540_v7, %v326_v55  ;;  %v330_v55 = vpop.permute.xlu0 %329  ;;  %660 = vperm.xlu1 %1159, %v1045_v56  }
 0x104   :  { %v1197_v48 = vpop.eup %1196  ;;  %v376_v10 = vmul.f32 %v1534_v3, %v330_v55  ;;  %v377_v15 = vmul.f32 %v1540_v7, %v330_v55 }
 0x105   :  { %v406_v32 = vadd.f32 %v374_v18, %v270_v27  ;;  %v407_v34 = vadd.f32 %v375_v61, %v271_v52  ;;  %v1051_v52 = vld [vmem:[%s1839_s2 + $0xf0] sm:$0xff] }
 0x106   :  { %685 = vperm.xlu0 %1160, %v1050_v46  }
 0x107   :  { %v1199_v44 = vpop.eup %1198  ;;  %v111_v39 = vpop.permute.xlu1 %110 }
 0x108   :  { %v1201_v4 = vpop.eup %1200  ;;  %v1075_v12 = vpack.c.bf16 %v1199_v44, %v1195_v0  ;;  %v160_v33 = vmul.f32 %v1531_v2, %v111_v39  ;;  %v161_v37 = vmul.f32 %v1537_v5, %v111_v39 }
 0x109   :  { %v1073_v13 = vpack.c.bf16 %v1201_v4, %v1197_v48 }
 0x10a   :  { %v272_v4 = vadd.f32 %v1544_v9, %v160_v33  ;;  %v273_v39 = vadd.f32 %v1544_v9, %v161_v37  ;;  %695 = vperm.xlu0 %1160, %v1052_v50  }
 0x10b   :  { %1074 = vmatprep.subr.bf16.mxu0 %v1073_v13 }
 0x10c   :  { %1076 = vmatpush1.bf16.msra.mxu0 %v1075_v12  ;;  %v458_v58 = vpop.permute.xlu1 %457  ;;  %v1047_v12 = vld [vmem:[%s1839_s2 + $0xd0] sm:$0xff]  ;;  %v408_v11 = vadd.f32 %v376_v10, %v272_v4  ;;  %v409_v61 = vadd.f32 %v377_v15, %v273_v39 }
 0x10d   :  { %v508_v24 = vmul.f32 %v1550_v14, %v458_v58  ;;  %v509_v25 = vmul.f32 %v1554_v16, %v458_v58  ;;  %670 = vperm.xlu1 %1159, %v1047_v12  }
 0x10e   :  { %979 = vperm.xlu0 %1160, %v1055_v63  }
 0x10f   :  { %v540_v23 = vadd.f32 %v508_v24, %v404_v43  ;;  %v541_v28 = vadd.f32 %v509_v25, %v405_v26  ;;  %v1049_v43 = vld [vmem:[%s1839_s2 + $0xe0] sm:$0xff] }
 0x110   :  { %v462_v30 = vpop.permute.xlu1 %461 }
 0x111   :  { %v510_v51 = vmul.f32 %v1550_v14, %v462_v30  ;;  %v511_v57 = vmul.f32 %v1554_v16, %v462_v30  ;;  %1202 = vtanh.f32 %v540_v23  ;;  %680 = vperm.xlu1 %1159, %v1049_v43  }
 0x112   :  { %1204 = vtanh.f32 %v541_v28  ;;  %1161 = vset.pattern.permute.xlu0 %v1295_v6  ;;  %v167_v6 = vmul.f32 %v1537_v5, %v1556_v17 }
 0x113   :  { %v542_v35 = vadd.f32 %v510_v51, %v406_v32  ;;  %v543_v20 = vadd.f32 %v511_v57, %v407_v34  ;;  %v338_v32 = vpop.permute.xlu0 %337  ;;  %v1054_v57 = vld [vmem:[%s1839_s2 + $0x100] sm:$0xff]  ;;  %1000 = vperm.xlu0 %1161, %v1055_v63  }
 0x114   :  { %v380_v37 = vmul.f32 %v1534_v3, %v338_v32  ;;  %v1025_v63 = vld [vmem:[%s1840_s1 + $0xa0] sm:$0xff] }
 0x115   :  { %1206 = vtanh.f32 %v542_v35  ;;  %v236_v42 = vpop.permute.xlu1 %235  ;;  %690 = vperm.xlu1 %1159, %v1051_v52   ;;  %v1032_v52 = vld [vmem:[%s1840_s1 + $0xd8] sm:$0xff] }
 0x116   :  { %1208 = vtanh.f32 %v543_v20  ;;  %v274_v24 = vadd.f32 %v236_v42, %v162_v47  ;;  %v275_v25 = vadd.f32 %v236_v42, %v163_v19  ;;  %v1056_v42 = vld [vmem:[%s1839_s2 + $0x180] sm:$0xff] }
 0x117   :  { %v478_v20 = vpop.permute.xlu0 %477 }
 0x118   :  { %v519_v33 = vmul.f32 %v1554_v16, %v478_v20 }
 0x119   :  { %897 = vperm.xlu1 %1159, %v1054_v57  }
 0x11a   :  { %v334_v53 = vpop.permute.xlu1 %333 }
 0x11b   :  { %v1203_v8 = vpop.eup %1202  ;;  %v378_v9 = vmul.f32 %v1534_v3, %v334_v53  ;;  %v379_v58 = vmul.f32 %v1540_v7, %v334_v53  ;;  %v518_v53 = vmul.f32 %v1550_v14, %v478_v20 }
 0x11c   :  { %v1205_v0 = vpop.eup %1204 }
 0x11d   :  { %v410_v23 = vadd.f32 %v378_v9, %v274_v24  ;;  %v411_v28 = vadd.f32 %v379_v58, %v275_v25  ;;  %994 = vperm.xlu1 %1159, %v1056_v42   ;;  %v1027_v24 = vld [vmem:[%s1840_s1 + $0xb0] sm:$0xff]  ;;  %v1028_v25 = vld [vmem:[%s1840_s1 + $0xb8] sm:$0xff] }
 0x11f   :  { %v1207_v48 = vpop.eup %1206  ;;  %v121_v62 = vpop.permute.xlu1 %120 }
 0x120   :  { %v1209_v44 = vpop.eup %1208  ;;  %v1079_v41 = vpack.c.bf16 %v1207_v48, %v1203_v8  ;;  %v164_v35 = vmul.f32 %v1531_v2, %v121_v62  ;;  %v165_v36 = vmul.f32 %v1537_v5, %v121_v62  ;;  %v381_v62 = vmul.f32 %v1540_v7, %v338_v32 }
 0x121   :  { %v1077_v13 = vpack.c.bf16 %v1209_v44, %v1205_v0 }
 0x122   :  { %v276_v45 = vadd.f32 %v1573_v29, %v164_v35  ;;  %v277_v0 = vadd.f32 %v1573_v29, %v165_v36 }
 0x123   :  { %1078 = vmatprep.subr.bf16.mxu0 %v1077_v13 }
 0x124   :  { %1080 = vmatpush1.bf16.msra.mxu0 %v1079_v41  ;;  %v466_v21 = vpop.permute.xlu1 %465  ;;  %v412_v12 = vadd.f32 %v380_v37, %v276_v45  ;;  %v413_v50 = vadd.f32 %v381_v62, %v277_v0 }
 0x125   :  { %v512_v22 = vmul.f32 %v1550_v14, %v466_v21  ;;  %v513_v18 = vmul.f32 %v1554_v16, %v466_v21 }
 0x127   :  { %v544_v54 = vadd.f32 %v512_v22, %v408_v11  ;;  %v545_v26 = vadd.f32 %v513_v18, %v409_v61  ;;  %v1023_v22 = vld [vmem:[%s1840_s1 + $0x90] sm:$0xff]  ;;  %v1024_v18 = vld [vmem:[%s1840_s1 + $0x98] sm:$0xff]  ;;  %v1026_v61 = vld [vmem:[%s1840_s1 + $0xa8] sm:$0xff] }
 0x128   :  { %v470_v27 = vpop.permute.xlu1 %469 }
 0x129   :  { %v514_v30 = vmul.f32 %v1550_v14, %v470_v27  ;;  %v515_v31 = vmul.f32 %v1554_v16, %v470_v27  ;;  %1210 = vtanh.f32 %v544_v54  ;;  %v1029_v54 = vld [vmem:[%s1840_s1 + $0xc0] sm:$0xff]  ;;  %v1031_v27 = vld [vmem:[%s1840_s1 + $0xd0] sm:$0xff] }
 0x12a   :  { %1212 = vtanh.f32 %v545_v26  ;;  %v1030_v26 = vld [vmem:[%s1840_s1 + $0xc8] sm:$0xff] }
 0x12b   :  { %v546_v34 = vadd.f32 %v514_v30, %v410_v23  ;;  %v547_v51 = vadd.f32 %v515_v31, %v411_v28  ;;  %v1033_v23 = vld [vmem:[%s1840_s1 + $0xe0] sm:$0xff]  ;;  %v1034_v28 = vld [vmem:[%s1840_s1 + $0xe8] sm:$0xff]  ;;  %v1035_v30 = vld [vmem:[%s1840_s1 + $0xf0] sm:$0xff] }
 0x12c   :  { %v1036_v31 = vld [vmem:[%s1840_s1 + $0xf8] sm:$0xff] }
 0x12d   :  { %1214 = vtanh.f32 %v546_v34  ;;  %v246_v38 = vpop.permute.xlu1 %245 }
 0x12e   :  { %1216 = vtanh.f32 %v547_v51  ;;  %v278_v56 = vadd.f32 %v246_v38, %v166_v40  ;;  %v279_v8 = vadd.f32 %v246_v38, %v167_v6 }
 0x132   :  { %v342_v49 = vpop.permute.xlu1 %341 }
 0x133   :  { %v382_v55 = vmul.f32 %v1534_v3, %v342_v49  ;;  %v383_v46 = vmul.f32 %v1540_v7, %v342_v49  ;;  %v1211_v2 = vpop.eup %1210 }
 0x134   :  { %v1213_v48 = vpop.eup %1212 }
 0x135   :  { %v414_v5 = vadd.f32 %v382_v55, %v278_v56  ;;  %v415_v17 = vadd.f32 %v383_v46, %v279_v8 }
 0x137   :  { %v1215_v44 = vpop.eup %1214  ;;  %v550_v4 = vadd.f32 %v518_v53, %v414_v5  ;;  %v551_v10 = vadd.f32 %v519_v33, %v415_v17  ;;  %v474_v41 = vpop.permute.xlu1 %473 }
 0x138   :  { %v1217_v13 = vpop.eup %1216  ;;  %v516_v39 = vmul.f32 %v1550_v14, %v474_v41  ;;  %v517_v15 = vmul.f32 %v1554_v16, %v474_v41  ;;  %v1083_v29 = vpack.c.bf16 %v1215_v44, %v1211_v2  ;;  %v1021_v14 = vld [vmem:[%s1840_s1 + $0x80] sm:$0xff]  ;;  %v1022_v16 = vld [vmem:[%s1840_s1 + $0x88] sm:$0xff] }
 0x139   :  { %v1081_v47 = vpack.c.bf16 %v1217_v13, %v1213_v48  ;;  %1218 = vtanh.f32 %v550_v4 }
 0x13a   :  { %v548_v3 = vadd.f32 %v516_v39, %v412_v12  ;;  %v549_v19 = vadd.f32 %v517_v15, %v413_v50  ;;  %1220 = vtanh.f32 %v551_v10 }
 0x13b   :  { %1082 = vmatprep.subr.bf16.mxu0 %v1081_v47 }
 0x13c   :  { %1222 = vtanh.f32 %v548_v3  ;;  %1084 = vmatpush1.bf16.msra.mxu0 %v1083_v29 }
 0x13d   :  { %1224 = vtanh.f32 %v549_v19 }
 0x143   :  { %v1219_v7 = vpop.eup %1218 }
 0x144   :  { %v1221_v11 = vpop.eup %1220 }
 0x146   :  { %v1223_v21 = vpop.eup %1222 }
 0x147   :  { %v1225_v43 = vpop.eup %1224  ;;  %v1087_v9 = vpack.c.bf16 %v1219_v7, %v1223_v21 }
 0x148   :  { %v1085_v58 = vpack.c.bf16 %v1221_v11, %v1225_v43 }
 0x14a   :  { %1086 = vmatprep.subr.bf16.mxu0 %v1085_v58 }
 0x14b   :  { %1088 = vmatpush1.bf16.msra.mxu0 %v1087_v9 }
 0x14e   :  { %763 = vmatmul.mubr.f32.vlgmr.msra.gmra.mrb[0].mxu0 %v1021_v14 }
 0x14f   :  { %768 = vmatprep.mubr.f32.mxu0 %v1297_v1 }
 0x152   :  { %769 = vmatmul.mubr.f32.gmra.mrb[2].mxu0 %v1022_v16 }
 0x153   :  { %774 = vmatprep.mubr.f32.mxu0 %v1297_v1 }
 0x156   :  { %775 = vmatmul.mubr.f32.gmra.mrb[4].mxu0 %v1023_v22 }
 0x157   :  { %780 = vmatprep.mubr.f32.mxu0 %v1297_v1 }
 0x15a   :  { %781 = vmatmul.mubr.f32.gmra.mrb[6].mxu0 %v1024_v18 }
 0x15b   :  { %786 = vmatprep.mubr.f32.mxu0 %v1297_v1 }
 0x15e   :  { %787 = vmatmul.mubr.f32.gmra.mrb[8].mxu0 %v1025_v63  ;;  %v621_v32 = vpop.permute.xlu1 %620 }
 0x15f   :  { %792 = vmatprep.mubr.f32.mxu0 %v1297_v1 }
 0x162   :  { %793 = vmatmul.mubr.f32.gmra.mrb[10].mxu0 %v1026_v61 }
 0x163   :  { %798 = vmatprep.mubr.f32.mxu0 %v1297_v1 }
 0x166   :  { %799 = vmatmul.mubr.f32.gmra.mrb[12].mxu0 %v1027_v24 }
 0x167   :  { %804 = vmatprep.mubr.f32.mxu0 %v1297_v1 }
 0x16a   :  { %805 = vmatmul.mubr.f32.gmra.mrb[14].mxu0 %v1028_v25 }
 0x16b   :  { %810 = vmatprep.mubr.f32.mxu0 %v1297_v1 }
 0x16e   :  { %811 = vmatmul.mubr.f32.gmra.mrb[16].mxu0 %v1029_v54 }
 0x16f   :  { %816 = vmatprep.mubr.f32.mxu0 %v1297_v1 }
 0x171   :  { %v626_v35 = vpop.permute.xlu1 %625  ;;  %v631_v6 = vpop.permute.xlu0 %630 }
 0x172   :  { %817 = vmatmul.mubr.f32.gmra.mrb[18].mxu0 %v1030_v26 }
 0x173   :  { %822 = vmatprep.mubr.f32.mxu0 %v1297_v1 }
 0x175   :  { %v636_v53 = vpop.permute.xlu1 %635  ;;  %v646_v12 = vpop.permute.xlu0 %645 }
 0x176   :  { %823 = vmatmul.mubr.f32.gmra.mrb[20].mxu0 %v1031_v27 }
 0x177   :  { %828 = vmatprep.mubr.f32.mxu0 %v1297_v1 }
 0x179   :  { %v656_v16 = vpop.permute.xlu0 %655 }
 0x17a   :  { %829 = vmatmul.mubr.f32.gmra.mrb[22].mxu0 %v1032_v52  ;;  %v641_v37 = vpop.permute.xlu1 %640 }
 0x17b   :  { %834 = vmatprep.mubr.f32.mxu0 %v1297_v1 }
 0x17e   :  { %835 = vmatmul.mubr.f32.gmra.mrb[24].mxu0 %v1033_v23  ;;  %v651_v3 = vpop.permute.xlu1 %650 }
 0x17f   :  { %840 = vmatprep.mubr.f32.mxu0 %v1297_v1 }
 0x182   :  { %841 = vmatmul.mubr.f32.gmra.mrb[26].mxu0 %v1034_v28  ;;  %v661_v54 = vpop.permute.xlu1 %660 }
 0x183   :  { %846 = vmatprep.mubr.f32.mxu0 %v1297_v1 }
 0x186   :  { %847 = vmatmul.mubr.f32.gmra.mrb[28].mxu0 %v1035_v30 }
 0x187   :  { %852 = vmatprep.mubr.f32.mxu0 %v1297_v1 }
 0x18a   :  { %853 = vmatmul.mubr.f32.gmra.mrb[30].mxu0 %v1036_v31 }
 0x221   :  { %v764_v34 = vpop.f32.mrb[0].mxu0 }
 0x222   :  { %v765_v51 = vadd.f32 %v764_v34, %v621_v32  ;;  %v766_v57 = vpop.f32.mrb[1].mxu0  ;;  %v666_v34 = vpop.permute.xlu0 %665 }
 0x223   :  { %v767_v38 = vadd.f32 %v766_v57, %v621_v32 }
 0x224   :  { %1226 = vtanh.f32 %v765_v51 }
 0x225   :  { %v770_v20 = vpop.f32.mrb[2].mxu0  ;;  %1228 = vtanh.f32 %v767_v38 }
 0x226   :  { %v771_v36 = vadd.f32 %v770_v20, %v626_v35  ;;  %v772_v42 = vpop.f32.mrb[3].mxu0 }
 0x227   :  { %v773_v40 = vadd.f32 %v772_v42, %v626_v35  ;;  %v671_v42 = vpop.permute.xlu1 %670 }
 0x228   :  { %1230 = vtanh.f32 %v771_v36 }
 0x229   :  { %1232 = vtanh.f32 %v773_v40  ;;  %v776_v1 = vpop.f32.mrb[4].mxu0 }
 0x22a   :  { %v777_v45 = vadd.f32 %v776_v1, %v631_v6  ;;  %v778_v49 = vpop.f32.mrb[5].mxu0 }
 0x22b   :  { %v779_v33 = vadd.f32 %v778_v49, %v631_v6 }
 0x22c   :  { %1234 = vtanh.f32 %v777_v45 }
 0x22d   :  { %v782_v56 = vpop.f32.mrb[6].mxu0  ;;  %1236 = vtanh.f32 %v779_v33 }
 0x22e   :  { %v783_v8 = vadd.f32 %v782_v56, %v636_v53  ;;  %v784_v55 = vpop.f32.mrb[7].mxu0  ;;  %v1227_v0 = vpop.eup %1226 }
 0x22f   :  { %v785_v46 = vadd.f32 %v784_v55, %v636_v53  ;;  %v1229_v2 = vpop.eup %1228 }
 0x230   :  { %1238 = vtanh.f32 %v783_v8  ;;  %v676_v8 = vpop.permute.xlu0 %675 }
 0x231   :  { %1240 = vtanh.f32 %v785_v46  ;;  %v788_v5 = vpop.f32.mrb[8].mxu0 }
 0x232   :  { %v1231_v17 = vpop.eup %1230  ;;  %v789_v48 = vadd.f32 %v788_v5, %v641_v37  ;;  %v790_v62 = vpop.f32.mrb[9].mxu0 }
 0x233   :  { %v1233_v44 = vpop.eup %1232  ;;  %v791_v4 = vadd.f32 %v790_v62, %v641_v37  ;;  %v1091_v10 = vpack.c.bf16 %v1231_v17, %v1227_v0  ;;  %v681_v17 = vpop.permute.xlu1 %680 }
 0x234   :  { %v1089_v41 = vpack.c.bf16 %v1233_v44, %v1229_v2  ;;  %1242 = vtanh.f32 %v789_v48 }
 0x235   :  { %v794_v13 = vpop.f32.mrb[10].mxu0  ;;  %1244 = vtanh.f32 %v791_v4 }
 0x236   :  { %v795_v50 = vadd.f32 %v794_v13, %v646_v12  ;;  %v796_v39 = vpop.f32.mrb[11].mxu0  ;;  %1090 = vmatprep.subr.bf16.mxu1 %v1089_v41  ;;  %v1235_v29 = vpop.eup %1234 }
 0x237   :  { %v797_v15 = vadd.f32 %v796_v39, %v646_v12  ;;  %1092 = vmatpush1.bf16.msra.mxu1 %v1091_v10  ;;  %v1237_v47 = vpop.eup %1236 }
 0x238   :  { %1246 = vtanh.f32 %v795_v50  ;;  %v686_v50 = vpop.permute.xlu0 %685 }
 0x239   :  { %1248 = vtanh.f32 %v797_v15  ;;  %v800_v19 = vpop.f32.mrb[12].mxu0 }
 0x23a   :  { %v1239_v7 = vpop.eup %1238  ;;  %v801_v11 = vadd.f32 %v800_v19, %v651_v3  ;;  %v802_v21 = vpop.f32.mrb[13].mxu0 }
 0x23b   :  { %v1241_v43 = vpop.eup %1240  ;;  %v803_v9 = vadd.f32 %v802_v21, %v651_v3  ;;  %v1095_v58 = vpack.c.bf16 %v1239_v7, %v1235_v29  ;;  %v691_v7 = vpop.permute.xlu1 %690 }
 0x23c   :  { %v1093_v14 = vpack.c.bf16 %v1241_v43, %v1237_v47  ;;  %1250 = vtanh.f32 %v801_v11 }
 0x23d   :  { %v806_v22 = vpop.f32.mrb[14].mxu0  ;;  %1252 = vtanh.f32 %v803_v9 }
 0x23e   :  { %v807_v18 = vadd.f32 %v806_v22, %v656_v16  ;;  %v808_v63 = vpop.f32.mrb[15].mxu0  ;;  %1094 = vmatprep.subr.bf16.mxu1 %v1093_v14  ;;  %v1243_v24 = vpop.eup %1242 }
 0x23f   :  { %v809_v61 = vadd.f32 %v808_v63, %v656_v16  ;;  %1096 = vmatpush1.bf16.msra.mxu1 %v1095_v58  ;;  %v1245_v25 = vpop.eup %1244 }
 0x240   :  { %1254 = vtanh.f32 %v807_v18  ;;  %v696_v18 = vpop.permute.xlu0 %695 }
 0x241   :  { %1256 = vtanh.f32 %v809_v61  ;;  %v812_v26 = vpop.f32.mrb[16].mxu0 }
 0x242   :  { %v1247_v27 = vpop.eup %1246  ;;  %v813_v52 = vadd.f32 %v812_v26, %v661_v54  ;;  %v814_v23 = vpop.f32.mrb[17].mxu0 }
 0x243   :  { %v1249_v28 = vpop.eup %1248  ;;  %v815_v30 = vadd.f32 %v814_v23, %v661_v54  ;;  %v1099_v31 = vpack.c.bf16 %v1247_v27, %v1243_v24 }
 0x244   :  { %v1097_v32 = vpack.c.bf16 %v1249_v28, %v1245_v25  ;;  %1258 = vtanh.f32 %v813_v52 }
 0x245   :  { %v818_v51 = vpop.f32.mrb[18].mxu0  ;;  %1260 = vtanh.f32 %v815_v30 }
 0x246   :  { %v819_v57 = vadd.f32 %v818_v51, %v666_v34  ;;  %v820_v38 = vpop.f32.mrb[19].mxu0  ;;  %1098 = vmatprep.subr.bf16.mxu1 %v1097_v32  ;;  %v1251_v20 = vpop.eup %1250 }
 0x247   :  { %v821_v35 = vadd.f32 %v820_v38, %v666_v34  ;;  %1100 = vmatpush1.bf16.msra.mxu1 %v1099_v31  ;;  %v1253_v36 = vpop.eup %1252  ;;  %v1053_v38 = vld [vmem:[%s1840_s1 + $0x100] sm:$0xff] }
 0x248   :  { %1262 = vtanh.f32 %v819_v57 }
 0x249   :  { %1264 = vtanh.f32 %v821_v35  ;;  %v824_v40 = vpop.f32.mrb[20].mxu0  ;;  %v898_v35 = vpop.permute.xlu1 %897 }
 0x24a   :  { %v1255_v6 = vpop.eup %1254  ;;  %v825_v1 = vadd.f32 %v824_v40, %v671_v42  ;;  %v826_v45 = vpop.f32.mrb[21].mxu0 }
 0x24b   :  { %v1257_v49 = vpop.eup %1256  ;;  %v827_v53 = vadd.f32 %v826_v45, %v671_v42  ;;  %v1103_v33 = vpack.c.bf16 %v1255_v6, %v1251_v20  ;;  %v980_v6 = vpop.permute.xlu0 %979 }
 0x24c   :  { %v1101_v56 = vpack.c.bf16 %v1257_v49, %v1253_v36  ;;  %1266 = vtanh.f32 %v825_v1 }
 0x24d   :  { %v830_v55 = vpop.f32.mrb[22].mxu0  ;;  %1268 = vtanh.f32 %v827_v53 }
 0x24e   :  { %v831_v46 = vadd.f32 %v830_v55, %v676_v8  ;;  %v832_v0 = vpop.f32.mrb[23].mxu0  ;;  %1102 = vmatprep.subr.bf16.mxu1 %v1101_v56  ;;  %v1259_v37 = vpop.eup %1258 }
 0x24f   :  { %v833_v2 = vadd.f32 %v832_v0, %v676_v8  ;;  %1104 = vmatpush1.bf16.msra.mxu1 %v1103_v33  ;;  %v1261_v5 = vpop.eup %1260  ;;  %v1001_v33 = vpop.permute.xlu0 %1000 }
 0x250   :  { %1270 = vtanh.f32 %v831_v46  ;;  %v995_v46 = vpop.permute.xlu1 %994 }
 0x251   :  { %1272 = vtanh.f32 %v833_v2  ;;  %v836_v48 = vpop.f32.mrb[24].mxu0 }
 0x252   :  { %v1263_v62 = vpop.eup %1262  ;;  %v837_v44 = vadd.f32 %v836_v48, %v681_v17  ;;  %v838_v4 = vpop.f32.mrb[25].mxu0 }
 0x253   :  { %v1265_v10 = vpop.eup %1264  ;;  %v839_v41 = vadd.f32 %v838_v4, %v681_v17  ;;  %v1107_v12 = vpack.c.bf16 %v1263_v62, %v1259_v37 }
 0x254   :  { %v1105_v13 = vpack.c.bf16 %v1265_v10, %v1261_v5  ;;  %1274 = vtanh.f32 %v837_v44 }
 0x255   :  { %v842_v39 = vpop.f32.mrb[26].mxu0  ;;  %1276 = vtanh.f32 %v839_v41 }
 0x256   :  { %v843_v15 = vadd.f32 %v842_v39, %v686_v50  ;;  %v844_v29 = vpop.f32.mrb[27].mxu0  ;;  %1106 = vmatprep.subr.bf16.mxu1 %v1105_v13  ;;  %v1267_v3 = vpop.eup %1266 }
 0x257   :  { %v845_v47 = vadd.f32 %v844_v29, %v686_v50  ;;  %1108 = vmatpush1.bf16.msra.mxu1 %v1107_v12  ;;  %v1269_v19 = vpop.eup %1268 }
 0x258   :  { %1278 = vtanh.f32 %v843_v15 }
 0x259   :  { %1280 = vtanh.f32 %v845_v47  ;;  %v848_v11 = vpop.f32.mrb[28].mxu0 }
 0x25a   :  { %v1271_v21 = vpop.eup %1270  ;;  %v849_v43 = vadd.f32 %v848_v11, %v691_v7  ;;  %v850_v9 = vpop.f32.mrb[29].mxu0 }
 0x25b   :  { %v1273_v58 = vpop.eup %1272  ;;  %v851_v14 = vadd.f32 %v850_v9, %v691_v7  ;;  %v1111_v16 = vpack.c.bf16 %v1271_v21, %v1267_v3 }
 0x25c   :  { %v1109_v22 = vpack.c.bf16 %v1273_v58, %v1269_v19  ;;  %1282 = vtanh.f32 %v849_v43 }
 0x25d   :  { %v854_v63 = vpop.f32.mrb[30].mxu0  ;;  %1284 = vtanh.f32 %v851_v14 }
 0x25e   :  { %v855_v61 = vadd.f32 %v854_v63, %v696_v18  ;;  %v856_v24 = vpop.f32.mrb[31].mxu0  ;;  %1110 = vmatprep.subr.bf16.mxu1 %v1109_v22  ;;  %v1275_v54 = vpop.eup %1274 }
 0x25f   :  { %v857_v25 = vadd.f32 %v856_v24, %v696_v18  ;;  %1112 = vmatpush1.bf16.msra.mxu1 %v1111_v16  ;;  %v1277_v26 = vpop.eup %1276 }
 0x260   :  { %1286 = vtanh.f32 %v855_v61 }
 0x261   :  { %1288 = vtanh.f32 %v857_v25 }
 0x262   :  { %v1279_v27 = vpop.eup %1278 }
 0x263   :  { %v1281_v52 = vpop.eup %1280  ;;  %v1115_v23 = vpack.c.bf16 %v1279_v27, %v1275_v54 }
 0x264   :  { %v1113_v28 = vpack.c.bf16 %v1281_v52, %v1277_v26 }
 0x266   :  { %1114 = vmatprep.subr.bf16.mxu1 %v1113_v28  ;;  %v1283_v30 = vpop.eup %1282 }
 0x267   :  { %1116 = vmatpush1.bf16.msra.mxu1 %v1115_v23  ;;  %v1285_v31 = vpop.eup %1284 }
 0x26a   :  { %v1287_v32 = vpop.eup %1286 }
 0x26b   :  { %v1289_v34 = vpop.eup %1288  ;;  %v1119_v51 = vpack.c.bf16 %v1287_v32, %v1283_v30 }
 0x26c   :  { %v1117_v57 = vpack.c.bf16 %v1289_v34, %v1285_v31 }
 0x26e   :  { %1118 = vmatprep.subr.bf16.mxu1 %v1117_v57 }
 0x26f   :  { %1120 = vmatpush1.bf16.msra.mxu1 %v1119_v51 }
 0x272   :  { %965 = vmatmul.mubr.f32.vlgmr.msra.gmra.mrb[0].mxu1 %v1053_v38 }
 0x345   :  { %v966_v20 = vpop.f32.mrb[0].mxu1 }
 0x346   :  { %v967_v36 = vadd.f32 %v966_v20, %v898_v35  ;;  %v968_v42 = vpop.f32.mrb[1].mxu1 }
 0x347   :  { %v969_v40 = vadd.f32 %v968_v42, %v898_v35 }
 0x348   :  { %1290 = vtanh.f32 %v967_v36 }
 0x349   :  { %1292 = vtanh.f32 %v969_v40 }
 0x352   :  { %v1291_v1 = vpop.eup %1290 }
 0x353   :  { %v1293_v45 = vpop.eup %1292  ;;  %v985_v49 = vrot.slane %v1291_v1, %v1516_v59  ;;  %v1006_v53 = vrot.slane %v1291_v1, %v1518_v60 }
 0x354   :  { %v989_v56 = vrot.slane %v1293_v45, %v1516_v59  ;;  %v1010_v8 = vrot.slane %v1293_v45, %v1518_v60 }
 0x355   :  { %v990_v55 = vmul.f32 %v985_v49, %v980_v6  ;;  %v1011_v37 = vmul.f32 %v1006_v53, %v1001_v33 }
 0x356   :  { %v991_v0 = vmul.f32 %v989_v56, %v980_v6  ;;  %v1012_v17 = vmul.f32 %v1010_v8, %v1001_v33 }
 0x357   :  { %v997_v2 = vadd.f32 %v995_v46, %v990_v55 }
 0x358   :  { %v998_v5 = vadd.f32 %v995_v46, %v991_v0 }
 0x359   :  { %v1013_v48 = vadd.f32 %v1011_v37, %v997_v2 }
 0x35a   :  { %v1014_v62 = vadd.f32 %v1012_v17, %v998_v5 }
 0x35b   :  { %1015 = vst [vmem:[%s1842_s3] sm:$0xff] %v1013_v48 }
 0x35c   :  { %1016 = vst [vmem:[%s1842_s3 + $0x8] sm:$0xff] %v1014_v62 }

</bundles_post_ra>
